<compile_context>
chip_gen: v7x
topology: tpu7x:2x2x1
jax: 0.10.0
libtpu: 0.0.40
codegen_flags: <defaults>
</compile_context>

<pallas_src>
import jax
import jax.numpy as jnp
from jax.experimental import pallas as pl
from jax.experimental.pallas import tpu as pltpu

_LANE = 1024  # lane-dense slab width (multiple of the 128-lane vreg width)


def _hard_swish(x):
    # fsigmoid(x) = relu6(x + 3) / 6 ; fSwish(x) = x * fsigmoid(x).
    # Compute in f32 (free on the VPU for an HBM-bound kernel), cast on store.
    xf = x.astype(jnp.float32)
    return xf * (jnp.clip(xf + 3.0, 0.0, 6.0) * (1.0 / 6.0))


def _fswish_kernel(x_ref, o_ref):
    o_ref[...] = _hard_swish(x_ref[...]).astype(o_ref.dtype)


def _device_tuning():
    """Per-generation (block_bytes, vmem_limit_bytes, use_core_parallel)."""
    try:
        kind = jax.devices()[0].device_kind.lower()
    except Exception:  # pragma: no cover
        kind = ""
    if "v7" in kind:
        # 2 TCs / 64 MiB VMEM per TC: 8 MiB blocks -> 32 MiB double-buffered
        # in+out, under a 48 MiB scoped limit. CORE_PARALLEL shards the grid
        # across both TensorCores (only way to reach the 3.2 TB/s roofline).
        return 8 << 20, 48 << 20, True
    if "v6" in kind or "trillium" in kind:
        # 128 MiB VMEM; 8 MiB blocks amortize the ~0.35us/step overhead to ~3%.
        return 8 << 20, 48 << 20, False
    if "v5" in kind:
        # v5e: keep blocks modest; still raise the 16 MiB default scoped limit.
        return 4 << 20, 32 << 20, False
    return 4 << 20, 32 << 20, False


def _run_elementwise(arr, block_shape, index_map, grid, n, itemsize,
                     vmem_limit_bytes, core_parallel):
    def build(dim_sems):
        return pl.pallas_call(
            _fswish_kernel,
            out_shape=jax.ShapeDtypeStruct(arr.shape, arr.dtype),
            grid_spec=pltpu.PrefetchScalarGridSpec(
                num_scalar_prefetch=0,
                grid=grid,
                in_specs=[pl.BlockSpec(block_shape, index_map)],
                out_specs=pl.BlockSpec(block_shape, index_map),
            ),
            # Output overwrites the input HBM buffer (same shape/dtype):
            # removes a second full-size HBM allocation.
            input_output_aliases={0: 0},
            compiler_params=pltpu.CompilerParams(
                dimension_semantics=dim_sems,
                vmem_limit_bytes=vmem_limit_bytes,
            ),
            # Advisory: mem-bound, 2 full HBM passes, ~6 VPU flops/element.
            cost_estimate=pl.CostEstimate(
                flops=6 * n, transcendentals=0,
                bytes_accessed=2 * n * itemsize),
        )

    if core_parallel:
        # v7x: shard the 1-D grid across both TensorCores. Fallback keeps the
        # kernel portable if CORE_PARALLEL is rejected on this chip/runtime
        # (only catchable here because we call eagerly, not under jit).
        try:
            return build((pltpu.CORE_PARALLEL,))(arr)
        except Exception:
            pass
    return build(("parallel",))(arr)


def fswish(x: jax.Array, *, lane_width: int = _LANE,
           target_block_bytes: int | None = None,
           vmem_limit_bytes: int | None = None,
           small_fallback_elems: int = 64 * 1024) -> jax.Array:
    """Elementwise hard-swish matching the PyTorch fSwish module (any shape)."""
    orig_shape = x.shape
    dtype = x.dtype
    itemsize = jnp.dtype(dtype).itemsize
    n = int(x.size)
    if n == 0:
        return x
    if n < small_fallback_elems:
        # pallas_call fixed overhead dominates tiny tensors; let XLA fuse it.
        return _hard_swish(x).astype(dtype)

    dev_block_bytes, dev_vmem_limit, core_parallel = _device_tuning()
    if target_block_bytes is None:
        target_block_bytes = dev_block_bytes
    if vmem_limit_bytes is None:
        vmem_limit_bytes = dev_vmem_limit

    flat = x.reshape(-1)

    if n % lane_width == 0:
        # Aligned fast path: lane-dense 2-D slab, no pad, no output slice.
        rows = n // lane_width
        x2d = flat.reshape(rows, lane_width)
        # Dtype-scaled block rows so block *bytes* stay constant.
        block_rows = max(8, target_block_bytes // (lane_width * itemsize))
        block_rows -= block_rows % 8           # (8, 128) second-minor rule
        block_rows = min(block_rows, rows)     # tiny input: full rows dim
        grid = (pl.cdiv(rows, block_rows),)
        out2d = _run_elementwise(
            x2d, (block_rows, lane_width), lambda i: (i, 0), grid,
            n, itemsize, vmem_limit_bytes, core_parallel)
        return out2d.reshape(orig_shape)

    # Ragged path: no jnp.pad / trailing slice (each is a full extra HBM pass).
    # Grid runs over the flat 1-D array; Pallas masks the partial trailing
    # block, and fswish never writes outside the real extent anyway.
    block_elems = max(1024, target_block_bytes // itemsize)
    block_elems -= block_elems % 1024          # lane (128) aligned
    block_elems = min(block_elems, n)          # small n: full (only) dim
    grid = (pl.cdiv(n, block_elems),)
    out_flat = _run_elementwise(
        flat, (block_elems,), lambda i: (i,), grid,
        n, itemsize, vmem_limit_bytes, core_parallel)
    return out_flat.reshape(orig_shape)


def fswish_ref(x: jax.Array) -> jax.Array:
    xf = x.astype(jnp.float32)
    return xf * (jnp.clip(xf + 3.0, 0.0, 6.0) / 6.0)


if __name__ == "__main__":
    key = jax.random.PRNGKey(0)
    # NCHW activation, same convention as the PyTorch module's conv inputs.
    x = jax.random.normal(key, (2, 4, 16, 16), dtype=jnp.float32) * 4.0

    # Force the Pallas path at this small test size (aligned 2-D slab path:
    # 2*4*16*16 = 2048 elements = 2 rows of 1024 lanes).
    out = jax.block_until_ready(fswish(x, small_fallback_elems=0))
    ref = fswish_ref(x)
    assert out.shape == x.shape and out.dtype == x.dtype
    assert jnp.allclose(out, ref, atol=1e-5, rtol=1e-5), "aligned path mismatch"

    # Ragged size -> copy-free 1-D path; small block forces a masked partial
    # trailing block (1155 elements, block of 1024).
    x2 = jax.random.normal(jax.random.PRNGKey(1), (3, 5, 7, 11), dtype=jnp.float32)
    out2 = jax.block_until_ready(
        fswish(x2, small_fallback_elems=0, target_block_bytes=4096))
    assert jnp.allclose(out2, fswish_ref(x2), atol=1e-5, rtol=1e-5), "ragged mismatch"

    # bf16 input: dtype-scaled blocks, f32 compute inside the kernel.
    x3 = (jax.random.normal(jax.random.PRNGKey(2), (2, 8, 16, 16)) * 4.0
          ).astype(jnp.bfloat16)
    out3 = jax.block_until_ready(fswish(x3, small_fallback_elems=0))
    assert out3.dtype == jnp.bfloat16
    assert jnp.allclose(out3.astype(jnp.float32), fswish_ref(x3),
                        atol=2e-2, rtol=2e-2), "bf16 mismatch"

    # Default tiny-tensor fallback (plain XLA fusion, no pallas_call).
    out4 = jax.block_until_ready(fswish(x))
    assert jnp.allclose(out4, ref, atol=1e-5, rtol=1e-5), "fallback mismatch"

    print("KERNEL_OK")
</pallas_src>

<mosaic_0001>
module attributes {stable_mosaic.version = 11 : i64} {
  func.func @_fswish_kernel(%arg0: i32, %arg1: memref<2x1024xf32, #tpu.memory_space<vmem>>, %arg2: memref<2x1024xf32, #tpu.memory_space<vmem>>) attributes {dimension_semantics = [#tpu.dimension_semantics<parallel>], iteration_bounds = array<i64: 1>, scalar_prefetch = 0 : i64, scratch_operands = 0 : i64, tpu.core_type = #tpu.core_type<tc>, window_params = [{transform_indices = @transform_0, window_bounds = array<i64: 2, 1024>}, {transform_indices = @transform_1, window_bounds = array<i64: 2, 1024>}]} {
    %c0 = arith.constant 0 : index
    %c0_0 = arith.constant 0 : index
    %0 = vector.load %arg1[%c0, %c0_0] : memref<2x1024xf32, #tpu.memory_space<vmem>>, vector<2x1024xf32>
    %cst = arith.constant 3.000000e+00 : f32
    %1 = vector.broadcast %cst : f32 to vector<2x1024xf32>
    %2 = arith.addf %0, %1 : vector<2x1024xf32>
    %cst_1 = arith.constant 0.000000e+00 : f32
    %cst_2 = arith.constant 6.000000e+00 : f32
    %3 = vector.broadcast %cst_1 : f32 to vector<2x1024xf32>
    %4 = arith.maximumf %3, %2 : vector<2x1024xf32>
    %5 = vector.broadcast %cst_2 : f32 to vector<2x1024xf32>
    %6 = arith.minimumf %5, %4 : vector<2x1024xf32>
    %cst_3 = arith.constant 0.166666672 : f32
    %7 = vector.broadcast %cst_3 : f32 to vector<2x1024xf32>
    %8 = arith.mulf %6, %7 : vector<2x1024xf32>
    %9 = arith.mulf %0, %8 : vector<2x1024xf32>
    %c0_4 = arith.constant 0 : index
    %c0_5 = arith.constant 0 : index
    %10 = vector.load %arg2[%c0_4, %c0_5] : memref<2x1024xf32, #tpu.memory_space<vmem>>, vector<2x1024xf32>
    tpu.vector_store %arg2[%c0_4, %c0_5], %9 {strides = array<i32>} : memref<2x1024xf32, #tpu.memory_space<vmem>>, vector<2x1024xf32>,
    return
  }
  func.func @transform_0(%arg0: i32) -> (i32, i32) {
    %c0_i32 = arith.constant 0 : i32
    %c0_i32_0 = arith.constant 0 : i32
    return %arg0, %c0_i32 : i32, i32
  }
  func.func @transform_1(%arg0: i32) -> (i32, i32) {
    %c0_i32 = arith.constant 0 : i32
    %c0_i32_0 = arith.constant 0 : i32
    return %arg0, %c0_i32 : i32, i32
  }
}

</mosaic_0001>

<bundles_post_ra>
// kernel: tpu_custom_call.1
= control target key start
LH: loop header
LB: loop body
LE: loop exit
PB: predicated region body
PF: predicated region fallthrough
CT: control target
= control target key end

     0   :  { %6 = vsyncpa [#allocation3], 0  ;;  %s136_s0 = inlined_call_operand.hbm [shape: f32[2,1024], index: 0, kind: input, shape index: {}, may-alias: {0,1}]   ;;  %s137_s1 = inlined_call_operand.hbm [shape: f32[2,1024], index: 1, kind: output, shape index: {}, may-alias: {0,1}]  }
   0x1   :  { %7 = vsyncpa [#allocation4], 0  ;;  %s100_s6 = smov [#allocation2]   ;;  %s52_s10 = scalar_lea.hbm %s136_s0, 256 }
   0x2   :  { %s14_s7 = sshll.u32 %s100_s6, 4  ;;  %p53_p0 = scmp.ne.s32.totalorder %s136_s0, %s52_s10  ;;  %s15_s7 = int_to_ptr.vmem [resolvable:$true] %s14_s7 }
   0x3   :  { %p56_p1 = scmp.lt.u32.totalorder %s52_s10, %s136_s0 }
   0x5   :  { %p58_p2 = pnand %p56_p1, %p53_p0 }
   0x7   :  { %61 = shalt.err (!%p58_p2)
}
   0x8   :  { %s62_s15 = scalar_lea.vmem %s15_s7, 256  ;;  %p67_p4 = scmp.lt.s32.totalorder %s15_s7, %s15_s7 }
   0x9   :  { %p63_p3 = scmp.ne.s32.totalorder %s15_s7, %s62_s15  ;;  %p68_p5 = scmp.lt.s32.totalorder %s62_s15, %s62_s15 }
   0xb   :  { %p69_p6 = por %p68_p5, %p67_p4 }
   0xd   :  { %p70_p7 = pnand %p69_p6, %p63_p3 }
   0xf   :  { %73 = shalt.err (!%p70_p7)
}
  0x10   :  { %17 = dma.hbm_to_vmem [thread:$0]  %s136_s0, 256, %s15_s7, [#allocation3]  }
  0x11   :  { %96 = dma.done.wait [#allocation3], 256  }
  0x12   :  { %97 = vsyncadd [#allocation3], 4294967040  ;;  %v21_v0 = vld [vmem:[#allocation2] sm:$0xff]  ;;  %v22_v1 = vld [vmem:[#allocation2 + $0x8] sm:$0xff]  ;;  %s101_s18 = smov [#allocation5]  }
  0x13   :  { %v23_v2 = vadd.f32 3.0, %v21_v0  ;;  %v24_v3 = vadd.f32 3.0, %v22_v1  ;;  %s41_s19 = sshll.u32 %s101_s18, 4  ;;  %s42_s19 = int_to_ptr.vmem [resolvable:$true] %s41_s19 }
  0x14   :  { %s74_s0 = scalar_lea.vmem %s42_s19, 256  ;;  %p79_p9 = scmp.lt.s32.totalorder %s42_s19, %s42_s19 }
  0x15   :  { %v25_v4 = vmax.f32 %v23_v2, 0.0  ;;  %v26_v5 = vmax.f32 %v24_v3, 0.0  ;;  %p75_p8 = scmp.ne.s32.totalorder %s42_s19, %s74_s0  ;;  %p80_p10 = scmp.lt.s32.totalorder %s74_s0, %s74_s0 }
  0x17   :  { %v27_v6 = vmin.f32 %v25_v4, 6.0  ;;  %v28_v7 = vmin.f32 %v26_v5, 6.0  ;;  %p81_p11 = por %p80_p10, %p79_p9 }
  0x19   :  { %v29_v8 = vmul.f32 0.16666667, %v27_v6  ;;  %v30_v9 = vmul.f32 0.16666667, %v28_v7  ;;  %p82_p12 = pnand %p81_p11, %p75_p8 }
  0x1b   :  { %v31_v10 = vmul.f32 %v29_v8, %v21_v0  ;;  %v32_v11 = vmul.f32 %v30_v9, %v22_v1 }
  0x1d   :  { %33 = vst [vmem:[#allocation5] sm:$0xff] %v31_v10  ;;  %34 = vst [vmem:[#allocation5 + $0x8] sm:$0xff] %v32_v11 }
  0x1e   :  { %85 = shalt.err (!%p82_p12)
}
  0x1f   :  { %s86_s22 = scalar_lea.hbm %s137_s1, 256 }
  0x20   :  { %p87_p13 = scmp.ne.s32.totalorder %s137_s1, %s86_s22  ;;  %p90_p0 = scmp.lt.u32.totalorder %s86_s22, %s137_s1 }
  0x22   :  { %p92_p1 = pnand %p90_p0, %p87_p13 }
  0x24   :  { %95 = shalt.err (!%p92_p1)
}
  0x25   :  { %44 = dma.vmem_to_hbm [thread:$0]  %s42_s19, 256, %s137_s1, [#allocation4]  }
  0x26   :  { %98 = dma.done.wait [#allocation4], 256  }
  0x27   :  { %99 = vsyncadd [#allocation4], 4294967040 }
  0x28   :  { %48 = vsyncpa [#allocation3], 1 }
  0x29   :  { %49 = vsyncpa [#allocation4], 1 }

</bundles_post_ra>
